<compile_context>
chip_gen: v5e
topology: v5e:2x2
jax: 0.10.0
libtpu: 0.0.40
codegen_flags: <defaults>
</compile_context>

<pallas_src>
import jax
import jax.numpy as jnp
from jax import lax
from jax.experimental import pallas as pl
from jax.experimental.pallas import tpu as pltpu


_INV_SQRT2 = 0.7071067811865476


def _mlp_kernel(x_ref, w1_ref, b1_ref, w2_ref, b2_ref, o_ref, acc_ref):
    # x_ref:  (TM, D)   activation row-tile (input dtype)
    # w1_ref: (TH, D)   fc1 weight H-slice, PyTorch (out, in) layout
    # b1_ref: (1, TH)   fc1 bias H-slice
    # w2_ref: (D, TH)   fc2 weight H-slice, PyTorch (out, in) layout
    # b2_ref: (1, D)    fc2 bias
    # o_ref:  (TM, D)   output row-tile
    # acc_ref:(TM, D)   f32 accumulator, resident across the H (reduction) axis
    h_idx = pl.program_id(1)

    @pl.when(h_idx == 0)
    def _init():
        acc_ref[...] = jnp.zeros_like(acc_ref)

    # fc1 H-slice: (TM, D) . (TH, D)^T -> (TM, TH); MXU in operand dtype,
    # f32 accumulation.
    h = lax.dot_general(
        x_ref[...], w1_ref[...],
        dimension_numbers=(((1,), (1,)), ((), ())),
        preferred_element_type=jnp.float32,
    )
    h = h + b1_ref[...].astype(jnp.float32)

    # Exact GELU (nn.GELU default), computed in f32 on the accumulator.
    h = 0.5 * h * (1.0 + lax.erf(h * jnp.float32(_INV_SQRT2)))

    # dropout(p=0.0) -> identity.
    # TODO(synk): dropout with p>0 would need pltpu.prng_seed/prng_random_bits masking.

    # fc2 H-slice: (TM, TH) . (D, TH)^T -> (TM, D); accumulate over H slices.
    acc_ref[...] += lax.dot_general(
        h.astype(x_ref.dtype), w2_ref[...],
        dimension_numbers=(((1,), (1,)), ((), ())),
        preferred_element_type=jnp.float32,
    )

    @pl.when(h_idx == pl.num_programs(1) - 1)
    def _finalize():
        # b2 is added exactly once, at finalize.
        o_ref[...] = (acc_ref[...] + b2_ref[...].astype(jnp.float32)).astype(o_ref.dtype)


def _round_up(a, b):
    return -(-a // b) * b


def mlp_forward(x, w1, b1, w2, b2, *, block_m=256, block_h=512):
    """MLP forward matching the PyTorch module (dropout p=0).

    x:  (B, N, D)
    w1: (H, D), b1: (H,)   -- PyTorch nn.Linear layouts (no transposes made)
    w2: (D, H), b2: (D,)
    """
    B, N, D = x.shape
    H = w1.shape[0]
    M = B * N

    x2d = x.reshape(M, D)

    # Row tile: MXU-aligned when M is large, 8-aligned full block otherwise.
    tm = block_m if M >= block_m else _round_up(M, 8)
    m_pad = _round_up(M, tm)
    if m_pad != M:
        x2d = jnp.pad(x2d, ((0, m_pad - M), (0, 0)))

    # H tile: largest MXU-aligned divisor of H, else the full H (small models).
    th = H
    for cand in (block_h, 512, 256, 128):
        if cand <= H and H % cand == 0:
            th = cand
            break

    grid = (m_pad // tm, H // th)

    out = pl.pallas_call(
        _mlp_kernel,
        out_shape=jax.ShapeDtypeStruct((m_pad, D), x.dtype),
        grid_spec=pltpu.PrefetchScalarGridSpec(
            num_scalar_prefetch=0,
            grid=grid,
            in_specs=[
                pl.BlockSpec((tm, D), lambda i, h: (i, 0)),   # x row tile
                pl.BlockSpec((th, D), lambda i, h: (h, 0)),   # W1 H-slice
                pl.BlockSpec((1, th), lambda i, h: (0, h)),   # b1 H-slice
                pl.BlockSpec((D, th), lambda i, h: (0, h)),   # W2 H-slice
                pl.BlockSpec((1, D), lambda i, h: (0, 0)),    # b2 (resident)
            ],
            out_specs=pl.BlockSpec((tm, D), lambda i, h: (i, 0)),
            scratch_shapes=[pltpu.VMEM((tm, D), jnp.float32)],
        ),
        compiler_params=pltpu.CompilerParams(
            dimension_semantics=("parallel", "arbitrary"),
        ),
    )(x2d, w1, b1.reshape(1, H), w2, b2.reshape(1, D))

    return out[:M].reshape(B, N, D)


if __name__ == "__main__":
    # Small shapes consistent with a Transformer MLP forward: (batch, seq, dim)
    B, N, D, H = 2, 8, 32, 64

    key = jax.random.PRNGKey(0)
    kx, k1, k2, k3, k4 = jax.random.split(key, 5)

    x = jax.random.normal(kx, (B, N, D), dtype=jnp.float32)
    # Deterministic parameter init (uniform, like nn.Linear's kaiming-uniform scale)
    w1 = jax.random.uniform(k1, (H, D), jnp.float32, -1.0, 1.0) / jnp.sqrt(D)
    b1 = jax.random.uniform(k2, (H,), jnp.float32, -1.0, 1.0) / jnp.sqrt(D)
    w2 = jax.random.uniform(k3, (D, H), jnp.float32, -1.0, 1.0) / jnp.sqrt(H)
    b2 = jax.random.uniform(k4, (D,), jnp.float32, -1.0, 1.0) / jnp.sqrt(H)

    y = jax.jit(mlp_forward)(x, w1, b1, w2, b2)
    jax.block_until_ready(y)

    # Reference check in plain JAX (exact-erf GELU, matching nn.GELU default)
    h_ref = jax.nn.gelu(x @ w1.T + b1, approximate=False)
    y_ref = h_ref @ w2.T + b2
    assert jnp.allclose(y, y_ref, atol=1e-4, rtol=1e-4), "mismatch vs reference"

    print("KERNEL_OK")
</pallas_src>

<mosaic_0001>
module attributes {stable_mosaic.version = 11 : i64} {
  func.func @_mlp_kernel(%arg0: i32, %arg1: i32, %arg2: memref<16x32xf32, #tpu.memory_space<vmem>>, %arg3: memref<64x32xf32, #tpu.memory_space<vmem>>, %arg4: memref<1x64xf32, #tpu.memory_space<vmem>>, %arg5: memref<32x64xf32, #tpu.memory_space<vmem>>, %arg6: memref<1x32xf32, #tpu.memory_space<vmem>>, %arg7: memref<16x32xf32, #tpu.memory_space<vmem>>, %arg8: memref<16x32xf32, #tpu.memory_space<vmem>>) attributes {dimension_semantics = [#tpu.dimension_semantics<parallel>, #tpu.dimension_semantics<arbitrary>], iteration_bounds = array<i64: 1, 1>, scalar_prefetch = 0 : i64, scratch_operands = 1 : i64, tpu.core_type = #tpu.core_type<tc>, window_params = [{transform_indices = @transform_0, window_bounds = array<i64: 16, 32>}, {transform_indices = @transform_1, window_bounds = array<i64: 64, 32>}, {transform_indices = @transform_2, window_bounds = array<i64: 1, 64>}, {transform_indices = @transform_3, window_bounds = array<i64: 32, 64>}, {pipeline_mode = #tpu.pipeline_mode<synchronous>, transform_indices = @transform_4, window_bounds = array<i64: 1, 32>}, {transform_indices = @transform_5, window_bounds = array<i64: 16, 32>}]} {
    %c0_i32 = arith.constant 0 : i32
    %0 = arith.cmpi eq, %arg1, %c0_i32 : i32
    %1 = arith.extui %0 : i1 to i32
    %c0_i32_0 = arith.constant 0 : i32
    %2 = arith.cmpi ne, %1, %c0_i32_0 : i32
    scf.if %2 {
      %cst_18 = arith.constant 0.000000e+00 : f32
      %25 = vector.broadcast %cst_18 : f32 to vector<16x32xf32>
      %c0_19 = arith.constant 0 : index
      %c0_20 = arith.constant 0 : index
      %26 = vector.load %arg8[%c0_19, %c0_20] : memref<16x32xf32, #tpu.memory_space<vmem>>, vector<16x32xf32>
      tpu.vector_store %arg8[%c0_19, %c0_20], %25 {strides = array<i32>} : memref<16x32xf32, #tpu.memory_space<vmem>>, vector<16x32xf32>,
    } else {
    }
    %c0 = arith.constant 0 : index
    %c0_1 = arith.constant 0 : index
    %3 = vector.load %arg2[%c0, %c0_1] : memref<16x32xf32, #tpu.memory_space<vmem>>, vector<16x32xf32>
    %c0_2 = arith.constant 0 : index
    %c0_3 = arith.constant 0 : index
    %4 = vector.load %arg3[%c0_2, %c0_3] : memref<64x32xf32, #tpu.memory_space<vmem>>, vector<64x32xf32>
    %cst = arith.constant dense<0.000000e+00> : vector<16x64xf32>
    %5 = tpu.matmul %3, %4, %cst {dimension_numbers = #tpu.dot_dimension_numbers<[1], [1], [0], [0], [0, 0, 1, 0], [], []>} : vector<16x32xf32>, vector<64x32xf32>, vector<16x64xf32> -> vector<16x64xf32>
    %c0_4 = arith.constant 0 : index
    %c0_5 = arith.constant 0 : index
    %6 = vector.load %arg4[%c0_4, %c0_5] : memref<1x64xf32, #tpu.memory_space<vmem>>, vector<1x64xf32>
    %7 = vector.broadcast %6 : vector<1x64xf32> to vector<16x64xf32>
    %8 = arith.addf %5, %7 : vector<16x64xf32>
    %cst_6 = arith.constant 5.000000e-01 : f32
    %9 = vector.broadcast %cst_6 : f32 to vector<16x64xf32>
    %10 = arith.mulf %9, %8 : vector<16x64xf32>
    %cst_7 = arith.constant 0.707106769 : f32
    %11 = vector.broadcast %cst_7 : f32 to vector<16x64xf32>
    %12 = arith.mulf %8, %11 : vector<16x64xf32>
    %13 = math.erf %12 : vector<16x64xf32>
    %cst_8 = arith.constant 1.000000e+00 : f32
    %14 = vector.broadcast %cst_8 : f32 to vector<16x64xf32>
    %15 = arith.addf %14, %13 : vector<16x64xf32>
    %16 = arith.mulf %10, %15 : vector<16x64xf32>
    %c0_9 = arith.constant 0 : index
    %c0_10 = arith.constant 0 : index
    %17 = vector.load %arg8[%c0_9, %c0_10] : memref<16x32xf32, #tpu.memory_space<vmem>>, vector<16x32xf32>
    %c0_11 = arith.constant 0 : index
    %c0_12 = arith.constant 0 : index
    %18 = vector.load %arg5[%c0_11, %c0_12] : memref<32x64xf32, #tpu.memory_space<vmem>>, vector<32x64xf32>
    %cst_13 = arith.constant dense<0.000000e+00> : vector<16x32xf32>
    %19 = tpu.matmul %16, %18, %cst_13 {dimension_numbers = #tpu.dot_dimension_numbers<[1], [1], [0], [0], [0, 0, 1, 0], [], []>} : vector<16x64xf32>, vector<32x64xf32>, vector<16x32xf32> -> vector<16x32xf32>
    %20 = arith.addf %17, %19 : vector<16x32xf32>
    %c0_14 = arith.constant 0 : index
    %c0_15 = arith.constant 0 : index
    %21 = vector.load %arg8[%c0_14, %c0_15] : memref<16x32xf32, #tpu.memory_space<vmem>>, vector<16x32xf32>
    tpu.vector_store %arg8[%c0_14, %c0_15], %20 {strides = array<i32>} : memref<16x32xf32, #tpu.memory_space<vmem>>, vector<16x32xf32>,
    %c0_i32_16 = arith.constant 0 : i32
    %22 = arith.cmpi eq, %arg1, %c0_i32_16 : i32
    %23 = arith.extui %22 : i1 to i32
    %c0_i32_17 = arith.constant 0 : i32
    %24 = arith.cmpi ne, %23, %c0_i32_17 : i32
    scf.if %24 {
      %c0_18 = arith.constant 0 : index
      %c0_19 = arith.constant 0 : index
      %25 = vector.load %arg8[%c0_18, %c0_19] : memref<16x32xf32, #tpu.memory_space<vmem>>, vector<16x32xf32>
      %c0_20 = arith.constant 0 : index
      %c0_21 = arith.constant 0 : index
      %26 = vector.load %arg6[%c0_20, %c0_21] : memref<1x32xf32, #tpu.memory_space<vmem>>, vector<1x32xf32>
      %27 = vector.broadcast %26 : vector<1x32xf32> to vector<16x32xf32>
      %28 = arith.addf %25, %27 : vector<16x32xf32>
      %c0_22 = arith.constant 0 : index
      %c0_23 = arith.constant 0 : index
      %29 = vector.load %arg7[%c0_22, %c0_23] : memref<16x32xf32, #tpu.memory_space<vmem>>, vector<16x32xf32>
      tpu.vector_store %arg7[%c0_22, %c0_23], %28 {strides = array<i32>} : memref<16x32xf32, #tpu.memory_space<vmem>>, vector<16x32xf32>,
    } else {
    }
    return
  }
  func.func @transform_0(%arg0: i32, %arg1: i32) -> (i32, i32) {
    %c0_i32 = arith.constant 0 : i32
    %c0_i32_0 = arith.constant 0 : i32
    return %arg0, %c0_i32 : i32, i32
  }
  func.func @transform_1(%arg0: i32, %arg1: i32) -> (i32, i32) {
    %c0_i32 = arith.constant 0 : i32
    %c0_i32_0 = arith.constant 0 : i32
    return %arg1, %c0_i32 : i32, i32
  }
  func.func @transform_2(%arg0: i32, %arg1: i32) -> (i32, i32) {
    %c0_i32 = arith.constant 0 : i32
    %c0_i32_0 = arith.constant 0 : i32
    return %c0_i32, %arg1 : i32, i32
  }
  func.func @transform_3(%arg0: i32, %arg1: i32) -> (i32, i32) {
    %c0_i32 = arith.constant 0 : i32
    %c0_i32_0 = arith.constant 0 : i32
    return %c0_i32, %arg1 : i32, i32
  }
  func.func @transform_4(%arg0: i32, %arg1: i32) -> (i32, i32) {
    %c0_i32 = arith.constant 0 : i32
    %c0_i32_0 = arith.constant 0 : i32
    %c0_i32_1 = arith.constant 0 : i32
    return %c0_i32, %c0_i32_0 : i32, i32
  }
  func.func @transform_5(%arg0: i32, %arg1: i32) -> (i32, i32) {
    %c0_i32 = arith.constant 0 : i32
    %c0_i32_0 = arith.constant 0 : i32
    return %arg0, %c0_i32 : i32, i32
  }
}

</mosaic_0001>

<bundles_post_ra>
// kernel: mlp_forward.1
= control target key start
LH: loop header
LB: loop body
LE: loop exit
PB: predicated region body
PF: predicated region fallthrough
CT: control target
= control target key end

     0   :  { %vm25_vm0 = vcmask 261120   ;;  %s462_s0 = inlined_call_operand.vmem [shape: f32[16,32], index: 0, kind: input, shape index: {}]   ;;  %s463_s1 = inlined_call_operand.vmem [shape: f32[64,32], index: 1, kind: input, shape index: {}]   ;;  %s464_s2 = inlined_call_operand.vmem [shape: f32[1,64], index: 2, kind: input, shape index: {}]   ;;  %s465_s3 = inlined_call_operand.vmem [shape: f32[32,64], index: 3, kind: input, shape index: {}]   ;;  %s466_s4 = inlined_call_operand.vmem [shape: f32[1,32], index: 4, kind: input, shape index: {}]   ;;  %s467_s5 = inlined_call_operand.hbm [shape: f32[16,32], index: 5, kind: output, shape index: {}]  }
   0x1   :  { %v37_v0 = vld [vmem:[%s463_s1 + $0x38] sm:$0xff]  ;;  %v36_v1 = vld [vmem:[%s463_s1 + $0x30] sm:$0xff] }
   0x2   :  { %267 = vmatpush.xpose.msk.msra.mxu0 %vm25_vm0, %v37_v0  ;;  %285 = vmatpush.xpose.msk.msra.mxu2 %vm25_vm0, %v37_v0 }
   0x3   :  { %10 = vsyncpa [#allocation4], 0  ;;  %v35_v2 = vld [vmem:[%s463_s1 + $0x28] sm:$0xff]  ;;  %v34_v3 = vld [vmem:[%s463_s1 + $0x20] sm:$0xff]  ;;  %vm190_vm1 = vcmask 523264   ;;  %v329_v56 = vmov 0.0  }
   0x4   :  { %v33_v4 = vld [vmem:[%s463_s1 + $0x18] sm:$0xff]  ;;  %v32_v5 = vld [vmem:[%s463_s1 + $0x10] sm:$0xff]  ;;  %v31_v6 = vld [vmem:[%s463_s1 + $0x8] sm:$0xff]  ;;  %26 = vst.msk [vmem:[#allocation2] sm:$0xff] %vm25_vm0, %v329_v56  ;;  %s330_s21 = smov [#allocation3]   ;;  %s255_s25 = sshll.u32 %s467_s5, 4  ;;  %s256_s25 = int_to_ptr.hbm [resolvable:$true] %s255_s25 }
   0x5   :  { %v30_v7 = vld [vmem:[%s463_s1] sm:$0xff]  ;;  %v29_v9 = vld [vmem:[%s462_s0 + $0x8] sm:$0xff]  ;;  %v189_v18 = vld [vmem:[%s465_s3 + $0x18] sm:$0xff]  ;;  %27 = vst.msk [vmem:[#allocation2 + $0x8] sm:$0xff] %vm25_vm0, %v329_v56  ;;  %s253_s22 = sshll.u32 %s330_s21, 4  ;;  %s332_s26 = smov 8   ;;  %s254_s22 = int_to_ptr.vmem [resolvable:$true] %s253_s22 }
   0x6   :  { %268 = vmatpush.xpose.msk.msra.mxu0 %vm25_vm0, %v36_v1  ;;  %286 = vmatpush.xpose.msk.msra.mxu2 %vm25_vm0, %v36_v1  ;;  %v28_v8 = vld [vmem:[%s462_s0] sm:$0xff]  ;;  %v188_v25 = vld [vmem:[%s465_s3 + $0x10] sm:$0xff]  ;;  %v187_v33 = vld [vmem:[%s465_s3 + $0x8] sm:$0xff] }
   0x7   :  { %v297_v10 = vld [vmem:[%s464_s2] ss:$0 sm:$0xff]  ;;  %279 = vmatpush.xpose.msk.msra.mxu1 %vm190_vm1, %v189_v18 }
   0x8   :  { %v186_v41 = vld [vmem:[%s465_s3] sm:$0xff] }
   0xa   :  { %269 = vmatpush.xpose.msk.msra.mxu0 %vm25_vm0, %v35_v2  ;;  %287 = vmatpush.xpose.msk.msra.mxu2 %vm25_vm0, %v35_v2 }
   0xb   :  { %280 = vmatpush.xpose.msk.msra.mxu1 %vm190_vm1, %v188_v25 }
   0xe   :  { %270 = vmatpush.xpose.msk.msra.mxu0 %vm25_vm0, %v34_v3  ;;  %288 = vmatpush.xpose.msk.msra.mxu2 %vm25_vm0, %v34_v3 }
   0xf   :  { %281 = vmatpush.xpose.msk.msra.mxu1 %vm190_vm1, %v187_v33 }
  0x12   :  { %271 = vmatpush.xpose.msk.msra.mxu0 %vm25_vm0, %v33_v4  ;;  %289 = vmatpush.xpose.msk.msra.mxu2 %vm25_vm0, %v33_v4 }
  0x13   :  { %282 = vmatpush.xpose.msk.msra.mxu1 %vm190_vm1, %v186_v41 }
  0x16   :  { %272 = vmatpush.xpose.msk.msra.mxu0 %vm25_vm0, %v32_v5  ;;  %290 = vmatpush.xpose.msk.msra.mxu2 %vm25_vm0, %v32_v5 }
  0x1a   :  { %273 = vmatpush.xpose.msk.msra.mxu0 %vm25_vm0, %v31_v6  ;;  %291 = vmatpush.xpose.msk.msra.mxu2 %vm25_vm0, %v31_v6 }
  0x1e   :  { %274 = vmatpush.xpose.msk.msra.mxu0 %vm25_vm0, %v30_v7  ;;  %292 = vmatpush.xpose.msk.msra.mxu2 %vm25_vm0, %v30_v7 }
  0x21   :  { %275 = vmatmul.msk.f32.vlgmr.msra.gmra.mxu0 %vm25_vm0, %v28_v8  ;;  %276 = vmatmul.msk.f32.vlgmr.msra.gmra.mxu2 %vm25_vm0, %v29_v9 }
  0x9e   :  { %v90_v11 = vpop.f32.mrf.mxu0 }
  0x9f   :  { %v414_v12 = vadd.f32 %v297_v10, %v90_v11 }
  0xa1   :  { %v417_v13 = vmul.f32 0.70710677, %v414_v12 }
  0xa3   :  { %v100_v14 = vmul.f32 %v417_v13, %v417_v13 }
  0xa4   :  { %v93_v15 = vpop.f32.mrf.mxu2 }
  0xa5   :  { %v101_v16 = vmin.f32 %v100_v14, 16.0  ;;  %v421_v17 = vadd.f32 %v297_v10, %v93_v15 }
  0xa7   :  { %v102_v19 = vmul.f32 2.1237322e-06, %v101_v16  ;;  %v113_v20 = vmul.f32 3.8918573e-05, %v101_v16  ;;  %v428_v21 = vmul.f32 0.70710677, %v421_v17 }
  0xa9   :  { %v103_v22 = vadd.f32 0.00028619796, %v102_v19  ;;  %v114_v23 = vadd.f32 0.001143296, %v113_v20  ;;  %v140_v24 = vmul.f32 %v428_v21, %v428_v21 }
  0xab   :  { %v104_v26 = vmul.f32 %v103_v22, %v101_v16  ;;  %v115_v27 = vmul.f32 %v114_v23, %v101_v16  ;;  %v141_v28 = vmin.f32 %v140_v24, 16.0 }
  0xad   :  { %v105_v29 = vadd.f32 0.0036580483, %v104_v26  ;;  %v116_v30 = vadd.f32 0.014752088, %v115_v27  ;;  %v142_v31 = vmul.f32 2.1237322e-06, %v141_v28 }
  0xae   :  { %v153_v32 = vmul.f32 3.8918573e-05, %v141_v28  ;;  %v96_v26 = vmul.f32 0.5, %v414_v12  ;;  %v184_v12 = vld [vmem:[#allocation2] sm:$0xff] }
  0xaf   :  { %v117_v34 = vmul.f32 %v116_v30, %v101_v16  ;;  %v143_v35 = vadd.f32 0.00028619796, %v142_v31  ;;  %v106_v38 = vmul.f32 %v105_v29, %v101_v16 }
  0xb0   :  { %v154_v36 = vadd.f32 0.001143296, %v153_v32 }
  0xb1   :  { %v118_v37 = vadd.f32 0.112945676, %v117_v34  ;;  %v144_v39 = vmul.f32 %v143_v35, %v141_v28  ;;  %v107_v46 = vadd.f32 0.05243302, %v106_v38  ;;  %v97_v35 = vmul.f32 0.5, %v421_v17 }
  0xb2   :  { %v155_v40 = vmul.f32 %v154_v36, %v141_v28 }
  0xb3   :  { %v119_v42 = vmul.f32 %v118_v37, %v101_v16  ;;  %v145_v45 = vadd.f32 0.0036580483, %v144_v39  ;;  %v108_v52 = vmul.f32 %v107_v46, %v101_v16  ;;  %v298_v39 = vld [vmem:[%s466_s4] ss:$0 sm:$0xff]  ;;  %s331_s4 = smov 128  }
  0xb4   :  { %v156_v43 = vadd.f32 0.014752088, %v155_v40 }
  0xb5   :  { %v120_v44 = vadd.f32 0.4994258, %v119_v42  ;;  %v146_v51 = vmul.f32 %v145_v45, %v141_v28  ;;  %v109_v57 = vadd.f32 0.18741608, %v108_v52 }
  0xb6   :  { %v157_v47 = vmul.f32 %v156_v43, %v141_v28 }
  0xb7   :  { %v121_v48 = vmul.f32 %v120_v44, %v101_v16  ;;  %v147_v55 = vadd.f32 0.05243302, %v146_v51  ;;  %v110_v62 = vmul.f32 %v109_v57, %v101_v16 }
  0xb8   :  { %v158_v49 = vadd.f32 0.112945676, %v157_v47 }
  0xb9   :  { %v122_v50 = vadd.f32 1.0, %v121_v48  ;;  %v148_v61 = vmul.f32 %v147_v55, %v141_v28  ;;  %v111_v3 = vadd.f32 1.1283791, %v110_v62 }
  0xba   :  { %v159_v53 = vmul.f32 %v158_v49, %v141_v28 }
  0xbb   :  { %299 = vrcp.f32 %v122_v50  ;;  %v134_v1 = vand.u32 2147483648, %v122_v50  ;;  %v149_v2 = vadd.f32 0.18741608, %v148_v61  ;;  %v132_v5 = vand.u32 2147483647, %v122_v50 }
  0xbc   :  { %v160_v54 = vadd.f32 0.4994258, %v159_v53  ;;  %vm128_vm3 = vweird.f32 %v122_v50  ;;  %v112_v11 = vmul.f32 %v111_v3, %v417_v13 }
  0xbd   :  { %v135_v8 = vor.u32 1.1754944e-38, %v134_v1  ;;  %v150_v9 = vmul.f32 %v149_v2, %v141_v28  ;;  %vm133_vm5 = vcmp.eq.f32.partialorder %v132_v5, 8.507059e+37 }
  0xbe   :  { %v161_v58 = vmul.f32 %v160_v54, %v141_v28 }
  0xbf   :  { %v151_v20 = vadd.f32 1.1283791, %v150_v9 }
  0xc0   :  { %v162_v59 = vadd.f32 1.0, %v161_v58 }
  0xc1   :  { %v300_v60 = vpop.eup %299  ;;  %v152_v13 = vmul.f32 %v151_v20, %v428_v21  ;;  %v185_v21 = vld [vmem:[#allocation2 + $0x8] sm:$0xff] }
  0xc2   :  { %v124_v63 = vmul.f32 %v300_v60, %v122_v50  ;;  %301 = vrcp.f32 %v162_v59  ;;  %vm129_vm2 = vweird.f32 %v300_v60  ;;  %v174_v19 = vand.u32 2147483648, %v162_v59 }
  0xc3   :  { %vm130_vm4 = vmor %vm128_vm3, %vm129_vm2  ;;  %v172_v23 = vand.u32 2147483647, %v162_v59  ;;  %vm168_vm7 = vweird.f32 %v162_v59 }
  0xc4   :  { %v125_v0 = vsub.f32 1.0, %v124_v63  ;;  %v175_v27 = vor.u32 1.1754944e-38, %v174_v19 }
  0xc5   :  { %vm173_vm9 = vcmp.eq.f32.partialorder %v172_v23, 8.507059e+37 }
  0xc6   :  { %v126_v4 = vmul.f32 %v300_v60, %v125_v0 }
  0xc8   :  { %v302_v6 = vpop.eup %301  ;;  %v127_v7 = vadd.f32 %v300_v60, %v126_v4 }
  0xc9   :  { %v164_v10 = vmul.f32 %v302_v6, %v162_v59  ;;  %vm169_vm6 = vweird.f32 %v302_v6 }
  0xca   :  { %v131_v14 = vsel %vm130_vm4, %v300_v60, %v127_v7  ;;  %vm170_vm8 = vmor %vm168_vm7, %vm169_vm6 }
  0xcb   :  { %v136_v15 = vsel %vm133_vm5, %v135_v8, %v131_v14  ;;  %v165_v16 = vsub.f32 1.0, %v164_v10 }
  0xcc   :  { %v137_v18 = vmul.f32 %v136_v15, %v112_v11 }
  0xcd   :  { %v166_v22 = vmul.f32 %v302_v6, %v165_v16 }
  0xce   :  { %v277_v24 = vclamps-f32 %v137_v18, 1.0 }
  0xcf   :  { %v167_v25 = vadd.f32 %v302_v6, %v166_v22 }
  0xd0   :  { %v180_v28 = vadd.f32 1.0, %v277_v24 }
  0xd1   :  { %v171_v29 = vsel %vm170_vm8, %v302_v6, %v167_v25 }
  0xd2   :  { %v176_v30 = vsel %vm173_vm9, %v175_v27, %v171_v29  ;;  %v182_v31 = vmul.f32 %v180_v28, %v96_v26 }
  0xd3   :  { %v177_v32 = vmul.f32 %v176_v30, %v152_v13 }
  0xd4   :  { %283 = vmatmul.msk.f32.vlgmr.msra.gmra.mxu1 %vm190_vm1, %v182_v31 }
  0xd5   :  { %v278_v33 = vclamps-f32 %v177_v32, 1.0 }
  0xd7   :  { %v181_v34 = vadd.f32 1.0, %v278_v33 }
  0xd9   :  { %v183_v36 = vmul.f32 %v181_v34, %v97_v35 }
  0xdc   :  { %284 = vmatmul.msk.f32.gmra.mxu1 %vm190_vm1, %v183_v36 }
 0x151   :  { %v226_v37 = vpop.f32.mrf.mxu1 }
 0x152   :  { %v232_v38 = vadd.f32 %v226_v37, %v184_v12 }
 0x154   :  { %234 = vst.msk [vmem:[#allocation2] sm:$0xff] %vm25_vm0, %v232_v38 }
 0x159   :  { %v229_v40 = vpop.f32.mrf.mxu1 }
 0x15a   :  { %v233_v41 = vadd.f32 %v229_v40, %v185_v21 }
 0x15b   :  { %v239_v42 = vld [vmem:[#allocation2] sm:$0xff] }
 0x15c   :  { %235 = vst.msk [vmem:[#allocation2 + $0x8] sm:$0xff] %vm25_vm0, %v233_v41  ;;  %v245_v43 = vadd.f32 %v298_v39, %v239_v42 }
 0x15e   :  { %247 = vst.msk [vmem:[#allocation3] sm:$0xff] %vm25_vm0, %v245_v43 }
 0x163   :  { %v240_v17 = vld [vmem:[#allocation2 + $0x8] sm:$0xff] }
 0x164   :  { %v246_v44 = vadd.f32 %v298_v39, %v240_v17 }
 0x166   :  { %248 = vst.msk [vmem:[#allocation3 + $0x8] sm:$0xff] %vm25_vm0, %v246_v44 }
 0x167   :  { %261 = dma.vmem_to_hbm [thread:$0]  %s254_s22, 256, %s256_s25, [#allocation4], %s331_s4, %s331_s4, %s332_s26  }
 0x168   :  { %327 = dma.done.wait [#allocation4], 256  }
 0x169   :  { %328 = vsyncadd [#allocation4], 4294967040 }
 0x16a   :  { %266 = vsyncpa [#allocation4], 1 }

</bundles_post_ra>
